<compile_context>
chip_gen: v7x
topology: tpu7x:2x2x1
jax: 0.10.0
libtpu: 0.0.40
codegen_flags: <defaults>
</compile_context>

<pallas_src>
import math

import jax
import jax.numpy as jnp
from jax.experimental import pallas as pl
from jax.experimental.pallas import tpu as pltpu


def _make_mixed_op_kernel(k):
    """Builds a kernel mixing k input tiles with k SMEM scalar weights."""

    def kernel(w_ref, *refs):
        # w_ref: (k,) f32 mixing weights in SMEM.
        # refs:  (x_0, ..., x_{k-1}, o) -- each x_s and o is a (tm, tn) tile.
        o_ref = refs[-1]
        acc = w_ref[0] * refs[0][...].astype(jnp.float32)
        for s in range(1, k):                  # k is small & static -> unrolled
            acc = acc + w_ref[s] * refs[s][...].astype(jnp.float32)
        o_ref[...] = acc.astype(o_ref.dtype)

    return kernel


def _round_up(x, m):
    return ((x + m - 1) // m) * m


def mixed_op(xs, alphas=None, alpha_mamba=None, *, tm=512, tn=1024):
    """Weighted mixture of k same-shaped arrays (MixedOp.forward).

    xs:          list of k arrays, all with identical shape (..., d).
    alphas:      (k,) mixing logits/weights (ignored if alpha_mamba is given).
    alpha_mamba: optional python float; if set, weights are
                 [alpha_mamba, 1 - alpha_mamba] (requires k == 2).
    """
    k = len(xs)
    lead = xs[0].shape
    N = lead[-1]
    M = math.prod(lead[:-1]) if len(lead) > 1 else 1

    # Mixing weights (k scalars).
    # TODO(synk): the k-scalar `sum()==1` check and softmax are computed in
    # plain JAX here (k is tiny); only the heavy weighted sum runs in Pallas.
    if alpha_mamba is not None:
        assert k == 2, "alpha_mamba path mixes exactly two inputs"
        w = jnp.asarray([alpha_mamba, 1.0 - alpha_mamba], dtype=jnp.float32)
    else:
        a = jnp.asarray(alphas, dtype=jnp.float32)
        w = jnp.where(jnp.sum(a) == 1.0, a, jax.nn.softmax(a))

    # Flatten leading dims; the feature axis stays last (lane axis).
    # (reshape of contiguous leading dims is metadata-only -> no HBM copy)
    xs2 = [x.reshape(M, N) for x in xs]

    # Lane-dense tiles; ragged M / N handled by Pallas edge-tile masking.
    tn_eff = min(tn, _round_up(N, 128))        # multiple of 128
    tm_eff = min(tm, _round_up(M, 8))          # multiple of 8
    grid = (pl.cdiv(M, tm_eff), pl.cdiv(N, tn_eff))

    itemsize = int(jnp.dtype(xs[0].dtype).itemsize)
    x_spec = pl.BlockSpec((tm_eff, tn_eff), lambda i, j: (i, j))

    out = pl.pallas_call(
        _make_mixed_op_kernel(k),
        out_shape=jax.ShapeDtypeStruct((M, N), xs[0].dtype),
        grid_spec=pltpu.PrefetchScalarGridSpec(
            num_scalar_prefetch=0,
            grid=grid,
            in_specs=[
                # k mixing weights: whole array in SMEM, read as scalars.
                pl.BlockSpec(memory_space=pltpu.MemorySpace.SMEM),
                # k separate inputs: one (tm, tn) tile each per grid point.
                *([x_spec] * k),
            ],
            out_specs=x_spec,
        ),
        compiler_params=pltpu.CompilerParams(
            dimension_semantics=("parallel", "parallel")),
        cost_estimate=pl.CostEstimate(
            flops=int(2 * k * M * N),
            transcendentals=0,
            bytes_accessed=int((k + 1) * M * N * itemsize)),
    )(w, *xs2)

    return out.reshape(lead)


if __name__ == "__main__":
    key = jax.random.PRNGKey(0)
    k = 2
    batch, seq, d_model = 2, 8, 128            # feature dim kept lane-dense (128)

    keys = jax.random.split(key, k)
    xs = [jax.random.normal(keys[i], (batch, seq, d_model), jnp.float32)
          for i in range(k)]

    # Path 1: learnable alphas initialized to zeros (module default) -> softmax mix.
    alphas = jnp.zeros((k,), jnp.float32)
    y = mixed_op(xs, alphas)
    y = jax.block_until_ready(y)

    w_ref = jnp.where(jnp.sum(alphas) == 1.0, alphas, jax.nn.softmax(alphas))
    ref = jnp.stack(xs, axis=-1) @ w_ref
    assert y.shape == xs[0].shape
    assert jnp.allclose(y, ref, atol=1e-5, rtol=1e-5)

    # Path 2: fixed alpha_mamba mixing weights [a, 1-a].
    y2 = mixed_op(xs, alphas, alpha_mamba=0.25)
    y2 = jax.block_until_ready(y2)
    ref2 = jnp.stack(xs, axis=-1) @ jnp.asarray([0.25, 0.75], jnp.float32)
    assert jnp.allclose(y2, ref2, atol=1e-5, rtol=1e-5)

    # Path 3: ragged shape (not multiples of 8 / 128) exercises edge-tile masking.
    xs3 = [jax.random.normal(kk, (3, 5, 200), jnp.float32)
           for kk in jax.random.split(jax.random.PRNGKey(1), k)]
    y3 = jax.block_until_ready(mixed_op(xs3, alphas))
    ref3 = jnp.stack(xs3, axis=-1) @ w_ref
    assert jnp.allclose(y3, ref3, atol=1e-5, rtol=1e-5)

    print("KERNEL_OK")
</pallas_src>

<mosaic_0001>
module attributes {stable_mosaic.version = 11 : i64} {
  func.func @kernel(%arg0: i32, %arg1: i32, %arg2: memref<2xf32, #tpu.memory_space<smem>>, %arg3: memref<16x128xf32, #tpu.memory_space<vmem>>, %arg4: memref<16x128xf32, #tpu.memory_space<vmem>>, %arg5: memref<16x128xf32, #tpu.memory_space<vmem>>) attributes {dimension_semantics = [#tpu.dimension_semantics<parallel>, #tpu.dimension_semantics<parallel>], iteration_bounds = array<i64: 1, 1>, scalar_prefetch = 0 : i64, scratch_operands = 0 : i64, tpu.core_type = #tpu.core_type<tc>, window_params = [{transform_indices = @transform_0, window_bounds = array<i64: 2>}, {transform_indices = @transform_1, window_bounds = array<i64: 16, 128>}, {transform_indices = @transform_2, window_bounds = array<i64: 16, 128>}, {transform_indices = @transform_3, window_bounds = array<i64: 16, 128>}]} {
    %c0 = arith.constant 0 : index
    %0 = memref.load %arg2[%c0] : memref<2xf32, #tpu.memory_space<smem>>
    %c0_0 = arith.constant 0 : index
    %c0_1 = arith.constant 0 : index
    %1 = vector.load %arg3[%c0_0, %c0_1] : memref<16x128xf32, #tpu.memory_space<vmem>>, vector<16x128xf32>
    %2 = vector.broadcast %0 : f32 to vector<16x128xf32>
    %3 = arith.mulf %2, %1 : vector<16x128xf32>
    %c1 = arith.constant 1 : index
    %4 = memref.load %arg2[%c1] : memref<2xf32, #tpu.memory_space<smem>>
    %c0_2 = arith.constant 0 : index
    %c0_3 = arith.constant 0 : index
    %5 = vector.load %arg4[%c0_2, %c0_3] : memref<16x128xf32, #tpu.memory_space<vmem>>, vector<16x128xf32>
    %6 = vector.broadcast %4 : f32 to vector<16x128xf32>
    %7 = arith.mulf %6, %5 : vector<16x128xf32>
    %8 = arith.addf %3, %7 : vector<16x128xf32>
    %c0_4 = arith.constant 0 : index
    %c0_5 = arith.constant 0 : index
    %9 = vector.load %arg5[%c0_4, %c0_5] : memref<16x128xf32, #tpu.memory_space<vmem>>, vector<16x128xf32>
    tpu.vector_store %arg5[%c0_4, %c0_5], %8 {strides = array<i32>} : memref<16x128xf32, #tpu.memory_space<vmem>>, vector<16x128xf32>,
    return
  }
  func.func @transform_0(%arg0: i32, %arg1: i32) -> i32 {
    %c0_i32 = arith.constant 0 : i32
    %c0_i32_0 = arith.constant 0 : i32
    return %c0_i32 : i32
  }
  func.func @transform_1(%arg0: i32, %arg1: i32) -> (i32, i32) {
    %c0_i32 = arith.constant 0 : i32
    return %arg0, %arg1 : i32, i32
  }
  func.func @transform_2(%arg0: i32, %arg1: i32) -> (i32, i32) {
    %c0_i32 = arith.constant 0 : i32
    return %arg0, %arg1 : i32, i32
  }
  func.func @transform_3(%arg0: i32, %arg1: i32) -> (i32, i32) {
    %c0_i32 = arith.constant 0 : i32
    return %arg0, %arg1 : i32, i32
  }
}

</mosaic_0001>

<bundles_post_ra>
// kernel: tpu_custom_call.1
= control target key start
LH: loop header
LB: loop body
LE: loop exit
PB: predicated region body
PF: predicated region fallthrough
CT: control target
= control target key end

     0   :  { %8 = vsyncpa [#allocation5], 0  ;;  %s263_s0 = inlined_call_operand.hbm [shape: f32[2], index: 0, kind: input, shape index: {}]   ;;  %s264_s1 = inlined_call_operand.hbm [shape: f32[16,128], index: 1, kind: input, shape index: {}]   ;;  %s265_s2 = inlined_call_operand.hbm [shape: f32[16,128], index: 2, kind: input, shape index: {}]   ;;  %s266_s3 = inlined_call_operand.hbm [shape: f32[16,128], index: 3, kind: output, shape index: {}]  }
   0x1   :  { %9 = vsyncpa [#allocation3], 0 }
   0x2   :  { %10 = vsyncpa [#allocation8], 0 }
   0x3   :  { %11 = vsyncpa [#allocation4], 0  ;;  %s96_s14 = scalar_lea.hbm %s263_s0, 16 }
   0x4   :  { %p97_p0 = scmp.ne.s32.totalorder %s263_s0, %s96_s14  ;;  %p100_p1 = scmp.lt.u32.totalorder %s96_s14, %s263_s0 }
   0x6   :  { %p102_p2 = pnand %p100_p1, %p97_p0 }
   0x8   :  { %105 = shalt.err (!%p102_p2)
}
   0x9   :  { %s180_s19 = smov [#allocation2]   ;;  %s181_s22 = smov [#allocation6]  }
   0xa   :  { %19 = dma.hbm_to_smem %s263_s0, 16, %s180_s19, [#allocation5]  }
   0xb   :  { %s25_s23 = sshll.u32 %s181_s22, 4  ;;  %s106_s26 = scalar_lea.hbm %s264_s1, 256  ;;  %s26_s23 = int_to_ptr.vmem [resolvable:$true] %s25_s23 }
   0xc   :  { %p107_p3 = scmp.ne.s32.totalorder %s264_s1, %s106_s26  ;;  %p110_p4 = scmp.lt.u32.totalorder %s106_s26, %s264_s1 }
   0xe   :  { %p112_p5 = pnand %p110_p4, %p107_p3 }
  0x10   :  { %115 = shalt.err (!%p112_p5)
}
  0x11   :  { %s116_s4 = scalar_lea.vmem %s26_s23, 256  ;;  %p121_p7 = scmp.lt.s32.totalorder %s26_s23, %s26_s23 }
  0x12   :  { %p117_p6 = scmp.ne.s32.totalorder %s26_s23, %s116_s4  ;;  %p122_p8 = scmp.lt.s32.totalorder %s116_s4, %s116_s4 }
  0x14   :  { %p123_p9 = por %p122_p8, %p121_p7 }
  0x16   :  { %p124_p10 = pnand %p123_p9, %p117_p6 }
  0x18   :  { %127 = shalt.err (!%p124_p10)
}
  0x19   :  { %s182_s0 = smov 128   ;;  %s183_s5 = smov 8  }
  0x1a   :  { %31 = dma.hbm_to_vmem [thread:$0]  %s264_s1, 256, %s26_s23, [#allocation3], %s182_s0, %s182_s0, %s183_s5  }
  0x1b   :  { %s184_s8 = smov [#allocation7]   ;;  %s128_s12 = scalar_lea.hbm %s265_s2, 256 }
  0x1c   :  { %s37_s9 = sshll.u32 %s184_s8, 4  ;;  %p129_p11 = scmp.ne.s32.totalorder %s265_s2, %s128_s12  ;;  %s38_s9 = int_to_ptr.vmem [resolvable:$true] %s37_s9 }
  0x1d   :  { %p132_p12 = scmp.lt.u32.totalorder %s128_s12, %s265_s2 }
  0x1f   :  { %p134_p13 = pnand %p132_p12, %p129_p11 }
  0x21   :  { %137 = shalt.err (!%p134_p13)
}
  0x22   :  { %s138_s17 = scalar_lea.vmem %s38_s9, 256  ;;  %p143_p1 = scmp.lt.s32.totalorder %s38_s9, %s38_s9 }
  0x23   :  { %p139_p0 = scmp.ne.s32.totalorder %s38_s9, %s138_s17  ;;  %p144_p2 = scmp.lt.s32.totalorder %s138_s17, %s138_s17 }
  0x25   :  { %p145_p3 = por %p144_p2, %p143_p1 }
  0x27   :  { %p146_p4 = pnand %p145_p3, %p139_p0 }
  0x29   :  { %149 = shalt.err (!%p146_p4)
}
  0x2a   :  { %43 = dma.hbm_to_vmem [thread:$0]  %s265_s2, 256, %s38_s9, [#allocation8], %s182_s0, %s182_s0, %s183_s5  }
  0x2b   :  { %172 = dma.done.wait [#allocation5], 16  }
  0x2c   :  { %173 = vsyncadd [#allocation5], 4294967280 }
  0x2d   :  { %174 = dma.done.wait [#allocation3], 256  }
  0x2e   :  { %175 = vsyncadd [#allocation3], 4294967040 }
  0x2f   :  { %176 = dma.done.wait [#allocation8], 256  }
  0x30   :  { %177 = vsyncadd [#allocation8], 4294967040 }
  0x31   :  { %53 = sfence }
  0x32   :  { %s54_s19 = sld [smem:[#allocation2]]  ;;  %s89_s20 = sld [smem:[#allocation2 + $0x1]]  ;;  %v55_v0 = vld [vmem:[#allocation6] sm:$0xff]  ;;  %v61_v1 = vld [vmem:[#allocation7] sm:$0xff]  ;;  %v56_v2 = vld [vmem:[#allocation6 + $0x8] sm:$0xff] }
  0x33   :  { %v62_v3 = vld [vmem:[#allocation7 + $0x8] sm:$0xff]  ;;  %s185_s21 = smov [#allocation9]  }
  0x34   :  { %s75_s22 = sshll.u32 %s185_s21, 4  ;;  %s76_s22 = int_to_ptr.vmem [resolvable:$true] %s75_s22 }
  0x35   :  { %s150_s2 = scalar_lea.vmem %s76_s22, 256  ;;  %p155_p6 = scmp.lt.s32.totalorder %s76_s22, %s76_s22 }
  0x36   :  { %p151_p5 = scmp.ne.s32.totalorder %s76_s22, %s150_s2  ;;  %p156_p7 = scmp.lt.s32.totalorder %s150_s2, %s150_s2 }
  0x38   :  { %v57_v4 = vstv %s54_s19  ;;  %v63_v5 = vstv %s89_s20  ;;  %p157_p8 = por %p156_p7, %p155_p6 }
  0x39   :  { %v58_v6 = vmul.f32 %v57_v4, %v55_v0  ;;  %v64_v7 = vmul.f32 %v63_v5, %v61_v1  ;;  %v59_v8 = vmul.f32 %v57_v4, %v56_v2  ;;  %v65_v9 = vmul.f32 %v63_v5, %v62_v3 }
  0x3a   :  { %p158_p9 = pnand %p157_p8, %p151_p5 }
  0x3b   :  { %v66_v10 = vadd.f32 %v64_v7, %v58_v6  ;;  %v67_v11 = vadd.f32 %v65_v9, %v59_v8 }
  0x3d   :  { %68 = vst [vmem:[#allocation9] sm:$0xff] %v66_v10  ;;  %69 = vst [vmem:[#allocation9 + $0x8] sm:$0xff] %v67_v11 }
  0x3e   :  { %161 = shalt.err (!%p158_p9)
}
  0x3f   :  { %s162_s25 = scalar_lea.hbm %s266_s3, 256 }
  0x40   :  { %p163_p10 = scmp.ne.s32.totalorder %s266_s3, %s162_s25  ;;  %p166_p11 = scmp.lt.u32.totalorder %s162_s25, %s266_s3 }
  0x42   :  { %p168_p12 = pnand %p166_p11, %p163_p10 }
  0x44   :  { %171 = shalt.err (!%p168_p12)
}
  0x45   :  { %81 = dma.vmem_to_hbm [thread:$0]  %s76_s22, 256, %s266_s3, [#allocation4], %s182_s0, %s182_s0, %s183_s5  }
  0x46   :  { %178 = dma.done.wait [#allocation4], 256  }
  0x47   :  { %179 = vsyncadd [#allocation4], 4294967040 }
  0x48   :  { %85 = vsyncpa [#allocation3], 1 }
  0x49   :  { %86 = vsyncpa [#allocation8], 1 }
  0x4a   :  { %87 = vsyncpa [#allocation4], 1 }
  0x4b   :  { %88 = vsyncpa [#allocation5], 1 }

</bundles_post_ra>
